<compile_context>
chip_gen: v7x
topology: tpu7x:2x2x1
jax: 0.10.0
libtpu: 0.0.40
codegen_flags: <defaults>
</compile_context>

<pallas_src>
import jax
import jax.numpy as jnp
from jax.experimental import pallas as pl
from jax.experimental.pallas import tpu as pltpu

LANES = 128
SUBLANES = 8
ACC_ROWS_MAX = 64          # wide accumulator: 8 independent f32 vregs


def _round_up(x, m):
    return (x + m - 1) // m * m


def _chip_config():
    """Return (tensorcores_per_chip, per-input per-block VMEM byte budget)."""
    kind = ""
    try:
        kind = jax.devices()[0].device_kind.lower()
    except Exception:
        pass
    if "7" in kind:                     # v7x: 2 TCs, 3.2 TB/s HBM -> big blocks
        return 2, 4 << 20
    if "v6" in kind or "6e" in kind:    # v6e: 1 TC, 1.4 TB/s
        return 1, 2 << 20
    return 1, 1 << 20                   # v5e / unknown: conservative default


def _make_sumsq_kernel(block_rows, acc_rows, tiles_per_core, valid_rows,
                       needs_mask, first_masked_tile, core_split):
    """Kernel accumulating lane-wise sum((yp - yt)^2) into out_ref (acc_rows, 128)."""
    n_chunks = block_rows // acc_rows

    def kernel(yp_ref, yt_ref, out_ref):
        if core_split:
            c = pl.program_id(0)        # CORE_PARALLEL axis
            j = pl.program_id(1)        # reduction ("arbitrary") axis
            tile_idx = c * tiles_per_core + j
        else:
            j = pl.program_id(0)
            tile_idx = j

        @pl.when(j == 0)
        def _():
            out_ref[...] = jnp.zeros_like(out_ref)

        def accum(mask_rows):
            def body(k, acc):
                r0 = pl.multiple_of(k * acc_rows, acc_rows)
                yp = yp_ref[pl.ds(r0, acc_rows), :].astype(jnp.float32)
                yt = yt_ref[pl.ds(r0, acc_rows), :].astype(jnp.float32)
                d = yp - yt
                sq = d * d
                if mask_rows:
                    row_ids = (tile_idx * block_rows + r0
                               + jax.lax.broadcasted_iota(jnp.int32, sq.shape, 0))
                    # select (not multiply): garbage/NaN in padded rows is discarded
                    sq = jnp.where(row_ids < valid_rows, sq, 0.0)
                return acc + sq

            init = jnp.zeros((acc_rows, LANES), jnp.float32)
            if n_chunks == 1:
                return body(0, init)
            return jax.lax.fori_loop(0, n_chunks, body, init)

        if needs_mask:
            # Only the ragged / redundant tiles pay for iota+compare+select.
            @pl.when(tile_idx < first_masked_tile)
            def _():
                out_ref[...] += accum(False)

            @pl.when(tile_idx >= first_masked_tile)
            def _():
                out_ref[...] += accum(True)
        else:
            out_ref[...] += accum(False)

    return kernel


def _sumsq_pallas(yp2, yt2):
    """sum((yp2 - yt2)^2) over a (rows, 128) slab via Pallas."""
    rows = yp2.shape[0]
    itemsize = jnp.dtype(yp2.dtype).itemsize

    ncores_hw, budget_bytes = _chip_config()
    # dtype-aware block rows targeting the per-generation byte budget
    budget_rows = max(ACC_ROWS_MAX,
                      (budget_bytes // (LANES * itemsize)) // ACC_ROWS_MAX * ACC_ROWS_MAX)
    block_rows = min(budget_rows, _round_up(rows, SUBLANES))

    n_tiles = pl.cdiv(rows, block_rows)
    ncores = ncores_hw if (ncores_hw > 1 and n_tiles >= 2) else 1
    tiles_per_core = pl.cdiv(n_tiles, ncores)
    total_tiles = ncores * tiles_per_core

    needs_mask = (total_tiles * block_rows) != rows
    first_masked_tile = n_tiles - 1 if (rows % block_rows) != 0 else n_tiles

    # Widest accumulator that divides block_rows (block_rows is a multiple of 8).
    acc_rows = SUBLANES
    for cand in (64, 32, 16):
        if block_rows % cand == 0:
            acc_rows = cand
            break

    kernel = _make_sumsq_kernel(block_rows, acc_rows, tiles_per_core, rows,
                                needs_mask, first_masked_tile,
                                core_split=(ncores > 1))

    block_bytes = block_rows * LANES * itemsize
    vmem_limit = int(min(60 << 20, max(16 << 20, 5 * block_bytes)))
    cost = pl.CostEstimate(
        flops=3 * rows * LANES,
        transcendentals=0,
        bytes_accessed=2 * rows * LANES * itemsize + ncores * acc_rows * LANES * 4,
    )

    if ncores > 1:
        grid = (ncores, tiles_per_core)

        def in_idx(c, j):
            # Clamp so redundant trailing grid points re-read a valid tile
            # (their contribution is masked to zero in the kernel).
            return (jnp.minimum(c * tiles_per_core + j, n_tiles - 1), 0)

        out_idx = lambda c, j: (c, 0)
        core_sem = getattr(pltpu, "CORE_PARALLEL", pltpu.PARALLEL)
        semantics = (core_sem, pltpu.ARBITRARY)
    else:
        grid = (n_tiles,)
        in_idx = lambda j: (j, 0)
        out_idx = lambda j: (0, 0)
        semantics = (pltpu.ARBITRARY,)

    partials = pl.pallas_call(
        kernel,
        out_shape=jax.ShapeDtypeStruct((ncores * acc_rows, LANES), jnp.float32),
        grid=grid,
        in_specs=[
            pl.BlockSpec((block_rows, LANES), in_idx),
            pl.BlockSpec((block_rows, LANES), in_idx),
        ],
        out_specs=pl.BlockSpec((acc_rows, LANES), out_idx),
        compiler_params=pltpu.CompilerParams(
            dimension_semantics=semantics,
            vmem_limit_bytes=vmem_limit,
        ),
        cost_estimate=cost,
    )(yp2, yt2)

    return jnp.sum(partials)


def rmse_loss(y_pred, y_true):
    assert y_pred.shape == y_true.shape
    n = y_pred.size
    yp = jnp.ravel(y_pred)
    yt = jnp.ravel(y_true)

    rows = n // LANES
    rem = n - rows * LANES

    total = jnp.float32(0.0)
    if rem:
        # Tiny (<128 element) unaligned tail handled in plain JAX.
        dt = (yp[rows * LANES:] - yt[rows * LANES:]).astype(jnp.float32)
        total = total + jnp.sum(dt * dt)

    if rows:
        if rem:
            # TODO(synk): this prefix slice feeding a custom call may
            # materialize a near-full-size copy of each input when n % 128 != 0;
            # a copy-free fix needs an in-kernel ragged-tail path (pl.ANY ref +
            # manual DMA / 1-D blocks), which is deliberately not risked here.
            yp_bulk = yp[: rows * LANES]
            yt_bulk = yt[: rows * LANES]
        else:
            yp_bulk = yp
            yt_bulk = yt
        yp2 = yp_bulk.reshape(rows, LANES)
        yt2 = yt_bulk.reshape(rows, LANES)
        total = total + _sumsq_pallas(yp2, yt2)

    # n is a static Python int -> no int32-overflow concern for huge tensors.
    return jnp.sqrt(total / float(n))


if __name__ == "__main__":
    key = jax.random.PRNGKey(0)
    rmse_jit = jax.jit(rmse_loss)

    def check(shape, k):
        k1, k2 = jax.random.split(k)
        yp = jax.random.normal(k1, shape, dtype=jnp.float32)
        yt = jax.random.normal(k2, shape, dtype=jnp.float32)
        got = jax.block_until_ready(rmse_jit(yp, yt))
        ref = jnp.sqrt(jnp.mean((yp - yt) ** 2))
        assert jnp.allclose(got, ref, rtol=1e-4, atol=1e-6), (shape, got, ref)

    keys = jax.random.split(key, 3)
    # small NCHW example matching the PyTorch module usage
    check((2, 4, 16, 16), keys[0])
    # multi-tile case: exercises big blocks, masking and (on v7x) the core split
    check((4, 16, 96, 96), keys[1])
    # element count not divisible by 128: exercises the plain-JAX tail path
    check((3, 5, 7, 11), keys[2])

    print("KERNEL_OK")
</pallas_src>

<mosaic_0001>
module attributes {stable_mosaic.version = 11 : i64} {
  func.func @kernel(%arg0: i32, %arg1: memref<16x128xf32, #tpu.memory_space<vmem>>, %arg2: memref<16x128xf32, #tpu.memory_space<vmem>>, %arg3: memref<16x128xf32, #tpu.memory_space<vmem>>) attributes {dimension_semantics = [#tpu.dimension_semantics<arbitrary>], iteration_bounds = array<i64: 1>, scalar_prefetch = 0 : i64, scratch_operands = 0 : i64, tpu.core_type = #tpu.core_type<tc>, window_params = [{transform_indices = @transform_0, window_bounds = array<i64: 16, 128>}, {transform_indices = @transform_1, window_bounds = array<i64: 16, 128>}, {pipeline_mode = #tpu.pipeline_mode<synchronous>, transform_indices = @transform_2, window_bounds = array<i64: 16, 128>}]} {
    %c0_i32 = arith.constant 0 : i32
    %0 = arith.cmpi eq, %arg0, %c0_i32 : i32
    %1 = arith.extui %0 : i1 to i32
    %c0_i32_0 = arith.constant 0 : i32
    %2 = arith.cmpi ne, %1, %c0_i32_0 : i32
    scf.if %2 {
      %cst_7 = arith.constant 0.000000e+00 : f32
      %15 = vector.broadcast %cst_7 : f32 to vector<16x128xf32>
      %c0_8 = arith.constant 0 : index
      %c0_9 = arith.constant 0 : index
      %16 = vector.load %arg3[%c0_8, %c0_9] : memref<16x128xf32, #tpu.memory_space<vmem>>, vector<16x128xf32>
      tpu.vector_store %arg3[%c0_8, %c0_9], %15 {strides = array<i32>} : memref<16x128xf32, #tpu.memory_space<vmem>>, vector<16x128xf32>,
    } else {
    }
    %c0 = arith.constant 0 : index
    %c0_1 = arith.constant 0 : index
    %3 = vector.load %arg3[%c0, %c0_1] : memref<16x128xf32, #tpu.memory_space<vmem>>, vector<16x128xf32>
    %cst = arith.constant 0.000000e+00 : f32
    %4 = vector.broadcast %cst : f32 to vector<16x128xf32>
    %c0_i32_2 = arith.constant 0 : i32
    %5 = tpu.assume_multiple %c0_i32_2, 16 : i32
    %6 = arith.index_cast %5 : i32 to index
    %c0_3 = arith.constant 0 : index
    %7 = vector.load %arg1[%6, %c0_3] : memref<16x128xf32, #tpu.memory_space<vmem>>, vector<16x128xf32>
    %8 = arith.index_cast %5 : i32 to index
    %c0_4 = arith.constant 0 : index
    %9 = vector.load %arg2[%8, %c0_4] : memref<16x128xf32, #tpu.memory_space<vmem>>, vector<16x128xf32>
    %10 = arith.subf %7, %9 : vector<16x128xf32>
    %11 = arith.mulf %10, %10 : vector<16x128xf32>
    %12 = arith.addf %4, %11 : vector<16x128xf32>
    %13 = arith.addf %3, %12 : vector<16x128xf32>
    %c0_5 = arith.constant 0 : index
    %c0_6 = arith.constant 0 : index
    %14 = vector.load %arg3[%c0_5, %c0_6] : memref<16x128xf32, #tpu.memory_space<vmem>>, vector<16x128xf32>
    tpu.vector_store %arg3[%c0_5, %c0_6], %13 {strides = array<i32>} : memref<16x128xf32, #tpu.memory_space<vmem>>, vector<16x128xf32>,
    return
  }
  func.func @transform_0(%arg0: i32) -> (i32, i32) {
    %c0_i32 = arith.constant 0 : i32
    %c0_i32_0 = arith.constant 0 : i32
    return %arg0, %c0_i32 : i32, i32
  }
  func.func @transform_1(%arg0: i32) -> (i32, i32) {
    %c0_i32 = arith.constant 0 : i32
    %c0_i32_0 = arith.constant 0 : i32
    return %arg0, %c0_i32 : i32, i32
  }
  func.func @transform_2(%arg0: i32) -> (i32, i32) {
    %c0_i32 = arith.constant 0 : i32
    %c0_i32_0 = arith.constant 0 : i32
    %c0_i32_1 = arith.constant 0 : i32
    return %c0_i32, %c0_i32_0 : i32, i32
  }
}

</mosaic_0001>

<bundles_post_ra>
// kernel: rmse_loss.1
= control target key start
LH: loop header
LB: loop body
LE: loop exit
PB: predicated region body
PF: predicated region fallthrough
CT: control target
= control target key end

     0   :  { %s71_s0 = inlined_call_operand.vmem [shape: f32[16,128], index: 0, kind: input, shape index: {}]   ;;  %s72_s1 = inlined_call_operand.vmem [shape: f32[16,128], index: 1, kind: input, shape index: {}]   ;;  %s73_s2 = inlined_call_operand.vmem [shape: f32[16,128], index: 2, kind: output, shape index: {}]  }
   0x1   :  { %v19_v0 = vld [vmem:[%s71_s0] sm:$0xff]  ;;  %v20_v2 = vld [vmem:[%s71_s0 + $0x8] sm:$0xff] }
   0x2   :  { %v21_v1 = vld [vmem:[%s72_s1] sm:$0xff]  ;;  %v22_v4 = vld [vmem:[%s72_s1 + $0x8] sm:$0xff] }
   0x3   :  { %v23_v3 = vsub.f32 %v19_v0, %v21_v1  ;;  %v24_v5 = vsub.f32 %v20_v2, %v22_v4 }
   0x5   :  { %v25_v6 = vmul.f32 %v23_v3, %v23_v3  ;;  %v26_v7 = vmul.f32 %v24_v5, %v24_v5 }
   0x7   :  { %31 = vst [vmem:[%s73_s2] sm:$0xff] %v25_v6  ;;  %32 = vst [vmem:[%s73_s2 + $0x8] sm:$0xff] %v26_v7 }

</bundles_post_ra>
